<compile_context>
chip_gen: v6e
topology: v6e:2x2x1
jax: 0.10.0
libtpu: 0.0.40
codegen_flags: <defaults>
</compile_context>

<pallas_src>
import functools
import math

import jax
import jax.numpy as jnp
from jax.experimental import pallas as pl
from jax.experimental.pallas import tpu as pltpu


def _round_up(x, m):
    return ((x + m - 1) // m) * m


# -----------------------------------------------------------------------------
# Kernel: one fused MXU matmul + elementwise gates on a (2*dp, tc) column tile.
# -----------------------------------------------------------------------------
def _gru2_kernel(x_ref, w_ref, out_ref, *, dp, mm_dtype):
    """x_ref  : (2*dp, tc) f32   rows = [fact ; bias rows ; 0 ; C ; 0]
       w_ref  : (4*dp, 2*dp) mm_dtype, row blocks = [z ; r ; Wh_in ; Wh_hid]
       out_ref: (dp, tc) f32
    """
    x = x_ref[...]                                             # f32

    # Single MXU dot (K = 2*dp): in+hid sums and all three biases are produced
    # directly by the systolic accumulation, one result drain total.
    pre = jnp.dot(w_ref[...], x.astype(mm_dtype),
                  preferred_element_type=jnp.float32)          # (4*dp, tc)

    # Static, dp(=128)-aligned 2-D row slices -- no rank-3 reshapes/relayouts.
    zr = jax.nn.sigmoid(pre[0:2 * dp, :])                      # one EUP issue
    z = zr[0:dp, :]
    r = zr[dp:2 * dp, :]
    h = jnp.tanh(pre[2 * dp:3 * dp, :] + r * pre[3 * dp:4 * dp, :])

    c = x[dp:2 * dp, :]                                        # C, kept in f32
    out_ref[...] = z * c + (1.0 - z) * h


# -----------------------------------------------------------------------------
# Parameter fusion (do once, reuse across calls).
# -----------------------------------------------------------------------------
def prepare_gru2_params(params, *, matmul_dtype=jnp.float32):
    """Fuse the 6 weights + 3 biases into one (4*dp, 2*dp) MXU block and a
    (3, dim) bias stack.  Hoist this out of the per-step path when the GRU is
    applied repeatedly."""
    dim = params["W_mem_upd_in"].shape[0]
    dp = _round_up(dim + 3, 128)   # +3 padded contraction rows carry biases

    W = jnp.zeros((4 * dp, 2 * dp), dtype=jnp.float32)
    # Contraction columns: [fact half | C half]; output row blocks: z, r,
    # Wh_in@fact, Wh_hid@C.
    W = W.at[0:dim, 0:dim].set(params["W_mem_upd_in"])
    W = W.at[0:dim, dp:dp + dim].set(params["W_mem_upd_hid"])
    W = W.at[dp:dp + dim, 0:dim].set(params["W_mem_res_in"])
    W = W.at[dp:dp + dim, dp:dp + dim].set(params["W_mem_res_hid"])
    W = W.at[2 * dp:2 * dp + dim, 0:dim].set(params["W_mem_hid_in"])
    W = W.at[3 * dp:3 * dp + dim, dp:dp + dim].set(params["W_mem_hid_hid"])
    # Bias fold: 1.0 columns route X's bias rows (fact rows dim..dim+2) into
    # exactly ONE gate block each (no double-adding).
    W = W.at[0:dim, dim].set(1.0)                    # + b_mem_upd  (z)
    W = W.at[dp:dp + dim, dim + 1].set(1.0)          # + b_mem_res  (r)
    W = W.at[2 * dp:2 * dp + dim, dim + 2].set(1.0)  # + b_mem_hid  (candidate)
    W = W.astype(matmul_dtype)

    b_stack = jnp.stack([params["b_mem_upd"], params["b_mem_res"],
                         params["b_mem_hid"]], axis=0).astype(jnp.float32)
    return dim, dp, W, b_stack


# -----------------------------------------------------------------------------
# Apply: fold (T, dim, B) activations into a wide column slab and run a
# column-tiled, parallel grid.
# -----------------------------------------------------------------------------
@functools.partial(jax.jit,
                   static_argnames=("dim", "matmul_dtype", "max_cols_tile"))
def gru2_apply_prepared(fact, C, w_fused, b_stack, *, dim,
                        matmul_dtype=jnp.float32, max_cols_tile=1024):
    """fact, C: (T, dim, B) with B == dim.  Returns (T, dim, B) f32."""
    T, dim_f, B = fact.shape
    dp = w_fused.shape[0] // 4
    assert dim_f == dim and C.shape == (T, dim, B)
    assert B == dim, "torch module's (dim,) column-bias broadcast needs B == dim"
    assert dp >= dim + 3

    # Fold T and B into one lane-dense column axis.
    cols = T * B
    tc = min(_round_up(cols, 128), max_cols_tile)   # column tile (mult. of 128)
    cols_pad = _round_up(cols, tc)

    fact_cols = jnp.transpose(fact.astype(jnp.float32),
                              (1, 0, 2)).reshape(dim, cols)
    c_cols = jnp.transpose(C.astype(jnp.float32),
                           (1, 0, 2)).reshape(dim, cols)
    bias_rows = jnp.tile(b_stack, (1, T))                       # (3, T*B)

    # X = [fact ; bias rows ; 0 ; C ; 0]  ->  (2*dp, cols_pad) f32.
    top = jnp.concatenate(
        [fact_cols, bias_rows,
         jnp.zeros((dp - dim - 3, cols), jnp.float32)], axis=0)
    bot = jnp.concatenate(
        [c_cols, jnp.zeros((dp - dim, cols), jnp.float32)], axis=0)
    x = jnp.pad(jnp.concatenate([top, bot], axis=0),
                ((0, 0), (0, cols_pad - cols)))
    # TODO(synk): in a real model, keep activations in this padded (dp, cols)
    # layout end-to-end so the pad/transpose/slice HBM round trips disappear.

    kernel = functools.partial(_gru2_kernel, dp=dp, mm_dtype=matmul_dtype)

    out = pl.pallas_call(
        kernel,
        out_shape=jax.ShapeDtypeStruct((dp, cols_pad), jnp.float32),
        grid=(cols_pad // tc,),
        in_specs=[
            pl.BlockSpec((2 * dp, tc), lambda j: (0, j)),       # activations
            # Pinned, constant weight block (block index never changes).
            # TODO(synk): pipeline_mode=pl.Buffered(1) if dim ever grows enough
            # for the double-buffered weight copy to matter on v7x's 64 MiB.
            pl.BlockSpec((4 * dp, 2 * dp), lambda j: (0, 0)),
        ],
        out_specs=pl.BlockSpec((dp, tc), lambda j: (0, j)),
        compiler_params=pltpu.CompilerParams(
            dimension_semantics=("parallel",)),   # column tiles split over TCs
    )(x, w_fused)

    out = out[:dim, :cols].reshape(dim, T, B)
    return jnp.transpose(out, (1, 0, 2))


def custom_gru2_batched(fact, C, params, *, matmul_dtype=jnp.float32):
    """Convenience: fuse params + apply.  fact, C: (T, dim, B), B == dim."""
    dim, _, w_fused, b_stack = prepare_gru2_params(params,
                                                   matmul_dtype=matmul_dtype)
    return gru2_apply_prepared(fact, C, w_fused, b_stack, dim=dim,
                               matmul_dtype=matmul_dtype)


def custom_gru2_forward(fact, C, params, *, matmul_dtype=jnp.float32):
    """JAX/Pallas equivalent of CustomGRU2.forward(fact, C)."""
    dim = params["W_mem_upd_in"].shape[0]
    C2d = jnp.squeeze(C, axis=0)                                # (dim, dim)
    if fact.shape[1] == dim and fact.shape[2] == dim:
        fact2d = jnp.squeeze(fact, axis=0)                      # square branch
    elif fact.shape[1] == 1:
        # torch: (1,1,dim) -> squeeze+permute -> (dim,1); its matmul result
        # broadcasts over columns, which is equivalent to tiling fact columns.
        fact2d = jnp.broadcast_to(jnp.squeeze(fact, axis=0).T, C2d.shape)
    else:
        raise ValueError("fact must be (1, dim, dim) or (1, 1, dim)")
    out = custom_gru2_batched(fact2d[None], C2d[None], params,
                              matmul_dtype=matmul_dtype)
    return out[0]


# -----------------------------------------------------------------------------
# Init + pure-JAX reference (for validation only).
# -----------------------------------------------------------------------------
def init_params(key, dim):
    """xavier_normal_ for 2-D weights, uniform(-stdv, stdv) for biases."""
    stdv = 1.0 / math.sqrt(dim)
    xavier_std = math.sqrt(2.0 / (dim + dim))
    names_2d = ["W_mem_res_in", "W_mem_res_hid", "W_mem_upd_in",
                "W_mem_upd_hid", "W_mem_hid_in", "W_mem_hid_hid"]
    names_1d = ["b_mem_res", "b_mem_upd", "b_mem_hid"]
    keys = jax.random.split(key, len(names_2d) + len(names_1d))
    params = {}
    for i, n in enumerate(names_2d):
        params[n] = (xavier_std *
                     jax.random.normal(keys[i], (dim, dim), dtype=jnp.float32))
    for j, n in enumerate(names_1d):
        params[n] = jax.random.uniform(keys[len(names_2d) + j], (dim,),
                                       minval=-stdv, maxval=stdv,
                                       dtype=jnp.float32)
    return params


def _reference(fact, C, params):
    """Pure-JAX reference of the torch forward (square-fact branch)."""
    f = jnp.squeeze(fact, axis=0)
    c = jnp.squeeze(C, axis=0)
    hp = jax.lax.Precision.HIGHEST
    mm = lambda a, b: jnp.dot(a, b, precision=hp)
    z = jax.nn.sigmoid(mm(params["W_mem_upd_in"], f)
                       + mm(params["W_mem_upd_hid"], c) + params["b_mem_upd"])
    r = jax.nn.sigmoid(mm(params["W_mem_res_in"], f)
                       + mm(params["W_mem_res_hid"], c) + params["b_mem_res"])
    h = jnp.tanh(mm(params["W_mem_hid_in"], f)
                 + r * mm(params["W_mem_hid_hid"], c) + params["b_mem_hid"])
    return z * c + (1.0 - z) * h


if __name__ == "__main__":
    dim = 32  # hidden_size (module hard-codes 100; semantics identical at 32)
    key = jax.random.PRNGKey(0)
    k_p, k_f, k_c = jax.random.split(key, 3)

    params = init_params(k_p, dim)
    fact = jax.random.normal(k_f, (1, dim, dim), dtype=jnp.float32)
    C = jax.random.normal(k_c, (1, dim, dim), dtype=jnp.float32)

    ref = _reference(fact, C, params)

    # 1) f32 MXU path. Tolerance covers default-vs-highest matmul precision
    #    differences between the XLA reference and the in-kernel MXU dot.
    out = jax.block_until_ready(custom_gru2_forward(fact, C, params))
    assert out.shape == (dim, dim)
    assert jnp.allclose(out, ref, atol=2e-3, rtol=2e-3), "f32 mismatch vs ref"

    # 2) bf16 MXU operands (v6e/v7x fast path), f32 accumulation + f32
    #    elementwise math -> looser tolerance.
    out_bf16 = jax.block_until_ready(
        custom_gru2_forward(fact, C, params, matmul_dtype=jnp.bfloat16))
    assert jnp.allclose(out_bf16, ref, atol=5e-2, rtol=5e-2), "bf16 mismatch"

    # 3) Batched path: T independent GRU applications folded into the lane
    #    axis of a single column-tiled pallas_call.
    T = 4
    k_fb, k_cb = jax.random.split(jax.random.PRNGKey(1))
    fact_b = jax.random.normal(k_fb, (T, dim, dim), dtype=jnp.float32)
    C_b = jax.random.normal(k_cb, (T, dim, dim), dtype=jnp.float32)
    out_b = jax.block_until_ready(custom_gru2_batched(fact_b, C_b, params))
    ref_b = jnp.stack([_reference(fact_b[t][None], C_b[t][None], params)
                       for t in range(T)])
    assert out_b.shape == (T, dim, dim)
    assert jnp.allclose(out_b, ref_b, atol=2e-3, rtol=2e-3), "batched mismatch"

    print("KERNEL_OK")
</pallas_src>

<mosaic_0001>
module attributes {stable_mosaic.version = 11 : i64} {
  func.func @_gru2_kernel(%arg0: i32, %arg1: memref<256x128xf32, #tpu.memory_space<vmem>>, %arg2: memref<512x256xf32, #tpu.memory_space<vmem>>, %arg3: memref<128x128xf32, #tpu.memory_space<vmem>>) attributes {dimension_semantics = [#tpu.dimension_semantics<parallel>], iteration_bounds = array<i64: 1>, scalar_prefetch = 0 : i64, scratch_operands = 0 : i64, tpu.core_type = #tpu.core_type<tc>, window_params = [{transform_indices = @transform_0, window_bounds = array<i64: 256, 128>}, {pipeline_mode = #tpu.pipeline_mode<synchronous>, transform_indices = @transform_1, window_bounds = array<i64: 512, 256>}, {transform_indices = @transform_2, window_bounds = array<i64: 128, 128>}]} {
    %c0 = arith.constant 0 : index
    %c0_0 = arith.constant 0 : index
    %0 = vector.load %arg1[%c0, %c0_0] : memref<256x128xf32, #tpu.memory_space<vmem>>, vector<256x128xf32>
    %c0_1 = arith.constant 0 : index
    %c0_2 = arith.constant 0 : index
    %1 = vector.load %arg2[%c0_1, %c0_2] : memref<512x256xf32, #tpu.memory_space<vmem>>, vector<512x256xf32>
    %cst = arith.constant dense<0.000000e+00> : vector<512x128xf32>
    %2 = tpu.matmul %1, %0, %cst {dimension_numbers = #tpu.dot_dimension_numbers<[1], [0], [0], [1], [0, 0, 1, 1], [], []>} : vector<512x256xf32>, vector<256x128xf32>, vector<512x128xf32> -> vector<512x128xf32>
    %3 = vector.extract_strided_slice %2 {offsets = [0, 0], sizes = [256, 128], strides = [1, 1]} : vector<512x128xf32> to vector<256x128xf32>
    %4 = arith.negf %3 : vector<256x128xf32>
    %5 = math.exp %4 : vector<256x128xf32>
    %cst_3 = arith.constant 1.000000e+00 : f32
    %6 = vector.broadcast %cst_3 : f32 to vector<256x128xf32>
    %7 = arith.addf %6, %5 : vector<256x128xf32>
    %8 = arith.divf %6, %7 : vector<256x128xf32>
    %9 = vector.extract_strided_slice %8 {offsets = [0, 0], sizes = [128, 128], strides = [1, 1]} : vector<256x128xf32> to vector<128x128xf32>
    %10 = vector.extract_strided_slice %8 {offsets = [128, 0], sizes = [128, 128], strides = [1, 1]} : vector<256x128xf32> to vector<128x128xf32>
    %11 = vector.extract_strided_slice %2 {offsets = [256, 0], sizes = [128, 128], strides = [1, 1]} : vector<512x128xf32> to vector<128x128xf32>
    %12 = vector.extract_strided_slice %2 {offsets = [384, 0], sizes = [128, 128], strides = [1, 1]} : vector<512x128xf32> to vector<128x128xf32>
    %13 = arith.mulf %10, %12 : vector<128x128xf32>
    %14 = arith.addf %11, %13 : vector<128x128xf32>
    %15 = math.tanh %14 : vector<128x128xf32>
    %16 = vector.extract_strided_slice %0 {offsets = [128, 0], sizes = [128, 128], strides = [1, 1]} : vector<256x128xf32> to vector<128x128xf32>
    %17 = arith.mulf %9, %16 : vector<128x128xf32>
    %cst_4 = arith.constant 1.000000e+00 : f32
    %18 = vector.broadcast %cst_4 : f32 to vector<128x128xf32>
    %19 = arith.subf %18, %9 : vector<128x128xf32>
    %20 = arith.mulf %19, %15 : vector<128x128xf32>
    %21 = arith.addf %17, %20 : vector<128x128xf32>
    %c0_5 = arith.constant 0 : index
    %c0_6 = arith.constant 0 : index
    %22 = vector.load %arg3[%c0_5, %c0_6] : memref<128x128xf32, #tpu.memory_space<vmem>>, vector<128x128xf32>
    tpu.vector_store %arg3[%c0_5, %c0_6], %21 {strides = array<i32>} : memref<128x128xf32, #tpu.memory_space<vmem>>, vector<128x128xf32>,
    return
  }
  func.func @transform_0(%arg0: i32) -> (i32, i32) {
    %c0_i32 = arith.constant 0 : i32
    %c0_i32_0 = arith.constant 0 : i32
    return %c0_i32, %arg0 : i32, i32
  }
  func.func @transform_1(%arg0: i32) -> (i32, i32) {
    %c0_i32 = arith.constant 0 : i32
    %c0_i32_0 = arith.constant 0 : i32
    %c0_i32_1 = arith.constant 0 : i32
    return %c0_i32, %c0_i32_0 : i32, i32
  }
  func.func @transform_2(%arg0: i32) -> (i32, i32) {
    %c0_i32 = arith.constant 0 : i32
    %c0_i32_0 = arith.constant 0 : i32
    return %c0_i32, %arg0 : i32, i32
  }
}

</mosaic_0001>

<bundles_post_ra>
// kernel: gru2_apply_prepared.1
= control target key start
LH: loop header
LB: loop body
LE: loop exit
PB: predicated region body
PF: predicated region fallthrough
CT: control target
= control target key end

     0   :  { %v1152_v0 = vmov 0.0   ;;  %s1987_s0 = inlined_call_operand.vmem [shape: f32[256,128], index: 0, kind: input, shape index: {}]   ;;  %s1988_s1 = inlined_call_operand.vmem [shape: f32[512,256], index: 1, kind: input, shape index: {}]   ;;  %s1989_s2 = inlined_call_operand.vmem [shape: f32[128,128], index: 2, kind: output, shape index: {}]  }
   0x1   :  { %171 = vmatprep.subr.mxu0 %v1152_v0  ;;  %v26_v1 = vld [vmem:[%s1987_s0 + $0x78] sm:$0xff]  ;;  %v25_v2 = vld [vmem:[%s1987_s0 + $0x70] sm:$0xff]  ;;  %912 = vmatprep.subr.mxu1 %v1152_v0  ;;  %v24_v3 = vld [vmem:[%s1987_s0 + $0x68] sm:$0xff] }
   0x2   :  { %172 = vmatpush1.msra.mxu0 %v26_v1  ;;  %944 = vmatpush1.msra.mxu1 %v26_v1  ;;  %v23_v4 = vld [vmem:[%s1987_s0 + $0x60] sm:$0xff]  ;;  %v22_v5 = vld [vmem:[%s1987_s0 + $0x58] sm:$0xff]  ;;  %v21_v6 = vld [vmem:[%s1987_s0 + $0x50] sm:$0xff] }
   0x3   :  { %173 = vmatprep.subr.mxu0 %v1152_v0  ;;  %913 = vmatprep.subr.mxu1 %v1152_v0  ;;  %v20_v7 = vld [vmem:[%s1987_s0 + $0x48] sm:$0xff]  ;;  %v19_v8 = vld [vmem:[%s1987_s0 + $0x40] sm:$0xff]  ;;  %v18_v9 = vld [vmem:[%s1987_s0 + $0x38] sm:$0xff] }
   0x4   :  { %174 = vmatpush1.msra.mxu0 %v25_v2  ;;  %945 = vmatpush1.msra.mxu1 %v25_v2  ;;  %v17_v10 = vld [vmem:[%s1987_s0 + $0x30] sm:$0xff]  ;;  %v16_v11 = vld [vmem:[%s1987_s0 + $0x28] sm:$0xff]  ;;  %v15_v12 = vld [vmem:[%s1987_s0 + $0x20] sm:$0xff] }
   0x5   :  { %175 = vmatprep.subr.mxu0 %v1152_v0  ;;  %914 = vmatprep.subr.mxu1 %v1152_v0  ;;  %v14_v13 = vld [vmem:[%s1987_s0 + $0x18] sm:$0xff]  ;;  %v13_v14 = vld [vmem:[%s1987_s0 + $0x10] sm:$0xff]  ;;  %v12_v15 = vld [vmem:[%s1987_s0 + $0x8] sm:$0xff] }
   0x6   :  { %176 = vmatpush1.msra.mxu0 %v24_v3  ;;  %946 = vmatpush1.msra.mxu1 %v24_v3  ;;  %v11_v16 = vld [vmem:[%s1987_s0] sm:$0xff]  ;;  %v42_v17 = vld [vmem:[%s1987_s0 + $0xf8] sm:$0xff]  ;;  %v44_v18 = vld [vmem:[%s1988_s1 + $0x8] sm:$0xff] }
   0x7   :  { %177 = vmatprep.subr.mxu0 %v1152_v0  ;;  %915 = vmatprep.subr.mxu1 %v1152_v0  ;;  %v41_v19 = vld [vmem:[%s1987_s0 + $0xf0] sm:$0xff]  ;;  %v40_v20 = vld [vmem:[%s1987_s0 + $0xe8] sm:$0xff]  ;;  %v39_v21 = vld [vmem:[%s1987_s0 + $0xe0] sm:$0xff] }
   0x8   :  { %178 = vmatpush1.msra.mxu0 %v23_v4  ;;  %947 = vmatpush1.msra.mxu1 %v23_v4  ;;  %v38_v22 = vld [vmem:[%s1987_s0 + $0xd8] sm:$0xff]  ;;  %v37_v23 = vld [vmem:[%s1987_s0 + $0xd0] sm:$0xff]  ;;  %v36_v24 = vld [vmem:[%s1987_s0 + $0xc8] sm:$0xff] }
   0x9   :  { %179 = vmatprep.subr.mxu0 %v1152_v0  ;;  %916 = vmatprep.subr.mxu1 %v1152_v0  ;;  %v35_v25 = vld [vmem:[%s1987_s0 + $0xc0] sm:$0xff]  ;;  %v34_v26 = vld [vmem:[%s1987_s0 + $0xb8] sm:$0xff]  ;;  %v33_v27 = vld [vmem:[%s1987_s0 + $0xb0] sm:$0xff] }
   0xa   :  { %180 = vmatpush1.msra.mxu0 %v22_v5  ;;  %948 = vmatpush1.msra.mxu1 %v22_v5  ;;  %v32_v28 = vld [vmem:[%s1987_s0 + $0xa8] sm:$0xff]  ;;  %v31_v29 = vld [vmem:[%s1987_s0 + $0xa0] sm:$0xff]  ;;  %v30_v30 = vld [vmem:[%s1987_s0 + $0x98] sm:$0xff] }
   0xb   :  { %181 = vmatprep.subr.mxu0 %v1152_v0  ;;  %917 = vmatprep.subr.mxu1 %v1152_v0  ;;  %v29_v31 = vld [vmem:[%s1987_s0 + $0x90] sm:$0xff]  ;;  %v28_v32 = vld [vmem:[%s1987_s0 + $0x88] sm:$0xff]  ;;  %v1328_v33 = vld [vmem:[%s1987_s0 + $0x80] sm:$0xff] }
   0xc   :  { %182 = vmatpush1.msra.mxu0 %v21_v6  ;;  %949 = vmatpush1.msra.mxu1 %v21_v6  ;;  %v43_v34 = vld [vmem:[%s1988_s1] sm:$0xff]  ;;  %v46_v35 = vld [vmem:[%s1988_s1 + $0x18] sm:$0xff]  ;;  %v108_v36 = vld [vmem:[%s1988_s1 + $0x208] sm:$0xff] }
   0xd   :  { %183 = vmatprep.subr.mxu0 %v1152_v0  ;;  %918 = vmatprep.subr.mxu1 %v1152_v0  ;;  %v107_v37 = vld [vmem:[%s1988_s1 + $0x200] sm:$0xff]  ;;  %v110_v38 = vld [vmem:[%s1988_s1 + $0x218] sm:$0xff]  ;;  %v45_v39 = vld [vmem:[%s1988_s1 + $0x10] sm:$0xff] }
   0xe   :  { %184 = vmatpush1.msra.mxu0 %v20_v7  ;;  %950 = vmatpush1.msra.mxu1 %v20_v7  ;;  %v48_v40 = vld [vmem:[%s1988_s1 + $0x28] sm:$0xff]  ;;  %v109_v41 = vld [vmem:[%s1988_s1 + $0x210] sm:$0xff]  ;;  %v47_v43 = vld [vmem:[%s1988_s1 + $0x20] sm:$0xff] }
   0xf   :  { %185 = vmatprep.subr.mxu0 %v1152_v0  ;;  %919 = vmatprep.subr.mxu1 %v1152_v0  ;;  %v112_v42 = vld [vmem:[%s1988_s1 + $0x228] sm:$0xff]  ;;  %v50_v44 = vld [vmem:[%s1988_s1 + $0x38] sm:$0xff]  ;;  %v111_v45 = vld [vmem:[%s1988_s1 + $0x220] sm:$0xff] }
  0x10   :  { %186 = vmatpush1.msra.mxu0 %v19_v8  ;;  %951 = vmatpush1.msra.mxu1 %v19_v8  ;;  %v114_v46 = vld [vmem:[%s1988_s1 + $0x238] sm:$0xff]  ;;  %v49_v47 = vld [vmem:[%s1988_s1 + $0x30] sm:$0xff]  ;;  %v52_v48 = vld [vmem:[%s1988_s1 + $0x48] sm:$0xff] }
  0x11   :  { %187 = vmatprep.subr.mxu0 %v1152_v0  ;;  %920 = vmatprep.subr.mxu1 %v1152_v0  ;;  %v113_v49 = vld [vmem:[%s1988_s1 + $0x230] sm:$0xff]  ;;  %v116_v50 = vld [vmem:[%s1988_s1 + $0x248] sm:$0xff]  ;;  %v51_v51 = vld [vmem:[%s1988_s1 + $0x40] sm:$0xff] }
  0x12   :  { %188 = vmatpush1.msra.mxu0 %v18_v9  ;;  %952 = vmatpush1.msra.mxu1 %v18_v9  ;;  %v54_v52 = vld [vmem:[%s1988_s1 + $0x58] sm:$0xff]  ;;  %v115_v53 = vld [vmem:[%s1988_s1 + $0x240] sm:$0xff]  ;;  %v53_v55 = vld [vmem:[%s1988_s1 + $0x50] sm:$0xff] }
  0x13   :  { %189 = vmatprep.subr.mxu0 %v1152_v0  ;;  %921 = vmatprep.subr.mxu1 %v1152_v0  ;;  %v118_v54 = vld [vmem:[%s1988_s1 + $0x258] sm:$0xff]  ;;  %v56_v56 = vld [vmem:[%s1988_s1 + $0x68] sm:$0xff]  ;;  %v117_v57 = vld [vmem:[%s1988_s1 + $0x250] sm:$0xff] }
  0x14   :  { %190 = vmatpush1.msra.mxu0 %v17_v10  ;;  %953 = vmatpush1.msra.mxu1 %v17_v10  ;;  %v120_v58 = vld [vmem:[%s1988_s1 + $0x268] sm:$0xff]  ;;  %v55_v59 = vld [vmem:[%s1988_s1 + $0x60] sm:$0xff]  ;;  %v58_v60 = vld [vmem:[%s1988_s1 + $0x78] sm:$0xff] }
  0x15   :  { %191 = vmatprep.subr.mxu0 %v1152_v0  ;;  %922 = vmatprep.subr.mxu1 %v1152_v0  ;;  %v119_v61 = vld [vmem:[%s1988_s1 + $0x260] sm:$0xff]  ;;  %v122_v62 = vld [vmem:[%s1988_s1 + $0x278] sm:$0xff]  ;;  %v57_v63 = vld [vmem:[%s1988_s1 + $0x70] sm:$0xff] }
  0x16   :  { %192 = vmatpush1.msra.mxu0 %v16_v11  ;;  %954 = vmatpush1.msra.mxu1 %v16_v11  ;;  %v121_v1 = vld [vmem:[%s1988_s1 + $0x270] sm:$0xff]  ;;  %v124_v2 = vld [vmem:[%s1988_s1 + $0x288] sm:$0xff]  ;;  %v59_v3 = vld [vmem:[%s1988_s1 + $0x80] sm:$0xff] }
  0x17   :  { %193 = vmatprep.subr.mxu0 %v1152_v0  ;;  %923 = vmatprep.subr.mxu1 %v1152_v0  ;;  %v62_v4 = vld [vmem:[%s1988_s1 + $0x98] sm:$0xff]  ;;  %v123_v5 = vld [vmem:[%s1988_s1 + $0x280] sm:$0xff]  ;;  %v61_v7 = vld [vmem:[%s1988_s1 + $0x90] sm:$0xff] }
  0x18   :  { %194 = vmatpush1.msra.mxu0 %v15_v12  ;;  %955 = vmatpush1.msra.mxu1 %v15_v12  ;;  %v126_v6 = vld [vmem:[%s1988_s1 + $0x298] sm:$0xff]  ;;  %v64_v8 = vld [vmem:[%s1988_s1 + $0xa8] sm:$0xff]  ;;  %v125_v9 = vld [vmem:[%s1988_s1 + $0x290] sm:$0xff] }
  0x19   :  { %195 = vmatprep.subr.mxu0 %v1152_v0  ;;  %924 = vmatprep.subr.mxu1 %v1152_v0  ;;  %v128_v10 = vld [vmem:[%s1988_s1 + $0x2a8] sm:$0xff]  ;;  %v63_v11 = vld [vmem:[%s1988_s1 + $0xa0] sm:$0xff]  ;;  %v66_v12 = vld [vmem:[%s1988_s1 + $0xb8] sm:$0xff] }
  0x1a   :  { %196 = vmatpush1.msra.mxu0 %v14_v13  ;;  %956 = vmatpush1.msra.mxu1 %v14_v13  ;;  %v127_v13 = vld [vmem:[%s1988_s1 + $0x2a0] sm:$0xff] }
  0x1b   :  { %197 = vmatprep.subr.mxu0 %v1152_v0  ;;  %925 = vmatprep.subr.mxu1 %v1152_v0 }
  0x1c   :  { %198 = vmatpush1.msra.mxu0 %v13_v14  ;;  %957 = vmatpush1.msra.mxu1 %v13_v14  ;;  %v130_v14 = vld [vmem:[%s1988_s1 + $0x2b8] sm:$0xff] }
  0x1d   :  { %199 = vmatprep.subr.mxu0 %v1152_v0  ;;  %926 = vmatprep.subr.mxu1 %v1152_v0 }
  0x1e   :  { %200 = vmatpush1.msra.mxu0 %v12_v15  ;;  %958 = vmatpush1.msra.mxu1 %v12_v15  ;;  %v65_v15 = vld [vmem:[%s1988_s1 + $0xb0] sm:$0xff] }
  0x1f   :  { %201 = vmatprep.subr.mxu0 %v1152_v0  ;;  %927 = vmatprep.subr.mxu1 %v1152_v0 }
  0x20   :  { %202 = vmatpush1.msra.mxu0 %v11_v16  ;;  %959 = vmatpush1.msra.mxu1 %v11_v16  ;;  %v68_v16 = vld [vmem:[%s1988_s1 + $0xc8] sm:$0xff] }
  0x21   :  { %203 = vmatprep.subr.mxu0 %v1152_v0  ;;  %928 = vmatprep.subr.mxu1 %v1152_v0 }
  0x22   :  { %204 = vmatpush2.msra.mxu0 %v42_v17  ;;  %960 = vmatpush2.msra.mxu1 %v42_v17  ;;  %v129_v17 = vld [vmem:[%s1988_s1 + $0x2b0] sm:$0xff] }
  0x23   :  { %205 = vmatprep.subr.mxu0 %v1152_v0  ;;  %235 = vmatprep.mubr.f32.mxu0 %v44_v18  ;;  %v132_v18 = vld [vmem:[%s1988_s1 + $0x2c8] sm:$0xff] }
  0x24   :  { %206 = vmatpush2.msra.mxu0 %v41_v19  ;;  %929 = vmatprep.subr.mxu1 %v1152_v0 }
  0x25   :  { %207 = vmatprep.subr.mxu0 %v1152_v0  ;;  %961 = vmatpush2.msra.mxu1 %v41_v19  ;;  %v67_v19 = vld [vmem:[%s1988_s1 + $0xc0] sm:$0xff] }
  0x26   :  { %208 = vmatpush2.msra.mxu0 %v40_v20  ;;  %930 = vmatprep.subr.mxu1 %v1152_v0 }
  0x27   :  { %209 = vmatprep.subr.mxu0 %v1152_v0  ;;  %962 = vmatpush2.msra.mxu1 %v40_v20  ;;  %v70_v20 = vld [vmem:[%s1988_s1 + $0xd8] sm:$0xff] }
  0x28   :  { %210 = vmatpush2.msra.mxu0 %v39_v21  ;;  %931 = vmatprep.subr.mxu1 %v1152_v0 }
  0x29   :  { %211 = vmatprep.subr.mxu0 %v1152_v0  ;;  %963 = vmatpush2.msra.mxu1 %v39_v21  ;;  %v131_v21 = vld [vmem:[%s1988_s1 + $0x2c0] sm:$0xff] }
  0x2a   :  { %212 = vmatpush2.msra.mxu0 %v38_v22  ;;  %932 = vmatprep.subr.mxu1 %v1152_v0 }
  0x2b   :  { %213 = vmatprep.subr.mxu0 %v1152_v0  ;;  %964 = vmatpush2.msra.mxu1 %v38_v22  ;;  %v134_v22 = vld [vmem:[%s1988_s1 + $0x2d8] sm:$0xff] }
  0x2c   :  { %214 = vmatpush2.msra.mxu0 %v37_v23  ;;  %933 = vmatprep.subr.mxu1 %v1152_v0 }
  0x2d   :  { %215 = vmatprep.subr.mxu0 %v1152_v0  ;;  %965 = vmatpush2.msra.mxu1 %v37_v23  ;;  %v69_v23 = vld [vmem:[%s1988_s1 + $0xd0] sm:$0xff] }
  0x2e   :  { %216 = vmatpush2.msra.mxu0 %v36_v24  ;;  %934 = vmatprep.subr.mxu1 %v1152_v0 }
  0x2f   :  { %217 = vmatprep.subr.mxu0 %v1152_v0  ;;  %966 = vmatpush2.msra.mxu1 %v36_v24  ;;  %v72_v24 = vld [vmem:[%s1988_s1 + $0xe8] sm:$0xff] }
  0x30   :  { %218 = vmatpush2.msra.mxu0 %v35_v25  ;;  %935 = vmatprep.subr.mxu1 %v1152_v0 }
  0x31   :  { %219 = vmatprep.subr.mxu0 %v1152_v0  ;;  %967 = vmatpush2.msra.mxu1 %v35_v25  ;;  %v133_v25 = vld [vmem:[%s1988_s1 + $0x2d0] sm:$0xff] }
  0x32   :  { %220 = vmatpush2.msra.mxu0 %v34_v26  ;;  %936 = vmatprep.subr.mxu1 %v1152_v0 }
  0x33   :  { %221 = vmatprep.subr.mxu0 %v1152_v0  ;;  %968 = vmatpush2.msra.mxu1 %v34_v26  ;;  %v136_v26 = vld [vmem:[%s1988_s1 + $0x2e8] sm:$0xff] }
  0x34   :  { %222 = vmatpush2.msra.mxu0 %v33_v27  ;;  %937 = vmatprep.subr.mxu1 %v1152_v0 }
  0x35   :  { %223 = vmatprep.subr.mxu0 %v1152_v0  ;;  %969 = vmatpush2.msra.mxu1 %v33_v27  ;;  %v71_v27 = vld [vmem:[%s1988_s1 + $0xe0] sm:$0xff] }
  0x36   :  { %224 = vmatpush2.msra.mxu0 %v32_v28  ;;  %938 = vmatprep.subr.mxu1 %v1152_v0 }
  0x37   :  { %225 = vmatprep.subr.mxu0 %v1152_v0  ;;  %970 = vmatpush2.msra.mxu1 %v32_v28  ;;  %v74_v28 = vld [vmem:[%s1988_s1 + $0xf8] sm:$0xff] }
  0x38   :  { %226 = vmatpush2.msra.mxu0 %v31_v29  ;;  %939 = vmatprep.subr.mxu1 %v1152_v0 }
  0x39   :  { %227 = vmatprep.subr.mxu0 %v1152_v0  ;;  %971 = vmatpush2.msra.mxu1 %v31_v29  ;;  %v135_v29 = vld [vmem:[%s1988_s1 + $0x2e0] sm:$0xff] }
  0x3a   :  { %228 = vmatpush2.msra.mxu0 %v30_v30  ;;  %940 = vmatprep.subr.mxu1 %v1152_v0 }
  0x3b   :  { %229 = vmatprep.subr.mxu0 %v1152_v0  ;;  %972 = vmatpush2.msra.mxu1 %v30_v30  ;;  %v138_v30 = vld [vmem:[%s1988_s1 + $0x2f8] sm:$0xff] }
  0x3c   :  { %230 = vmatpush2.msra.mxu0 %v29_v31  ;;  %941 = vmatprep.subr.mxu1 %v1152_v0 }
  0x3d   :  { %231 = vmatprep.subr.mxu0 %v1152_v0  ;;  %973 = vmatpush2.msra.mxu1 %v29_v31  ;;  %v73_v31 = vld [vmem:[%s1988_s1 + $0xf0] sm:$0xff] }
  0x3e   :  { %232 = vmatpush2.msra.mxu0 %v28_v32  ;;  %942 = vmatprep.subr.mxu1 %v1152_v0 }
  0x3f   :  { %233 = vmatprep.subr.mxu0 %v1152_v0  ;;  %974 = vmatpush2.msra.mxu1 %v28_v32  ;;  %v76_v32 = vld [vmem:[%s1988_s1 + $0x108] sm:$0xff] }
  0x40   :  { %234 = vmatpush2.msra.mxu0 %v1328_v33  ;;  %943 = vmatprep.subr.mxu1 %v1152_v0  ;;  %v60_v0 = vld [vmem:[%s1988_s1 + $0x88] sm:$0xff] }
  0x41   :  { %236 = vmatmul.mubr.f32.vlgmr.msra.gmra.mxu0 %v43_v34  ;;  %975 = vmatpush2.msra.mxu1 %v1328_v33  ;;  %v137_v34 = vld [vmem:[%s1988_s1 + $0x2f0] sm:$0xff] }
  0x42   :  { %240 = vmatprep.mubr.f32.mxu0 %v46_v35  ;;  %395 = vmatprep.mubr.f32.mxu1 %v108_v36  ;;  %v140_v35 = vld [vmem:[%s1988_s1 + $0x308] sm:$0xff]  ;;  %v75_v36 = vld [vmem:[%s1988_s1 + $0x100] sm:$0xff] }
  0x43   :  { %396 = vmatmul.mubr.f32.vlgmr.msra.gmra.mxu1 %v107_v37  ;;  %v78_v37 = vld [vmem:[%s1988_s1 + $0x118] sm:$0xff] }
  0x44   :  { %400 = vmatprep.mubr.f32.mxu1 %v110_v38  ;;  %v139_v38 = vld [vmem:[%s1988_s1 + $0x300] sm:$0xff] }
  0x45   :  { %241 = vmatmul.mubr.f32.gmra.mxu0 %v45_v39  ;;  %v142_v39 = vld [vmem:[%s1988_s1 + $0x318] sm:$0xff] }
  0x46   :  { %245 = vmatprep.mubr.f32.mxu0 %v48_v40  ;;  %v77_v40 = vld [vmem:[%s1988_s1 + $0x110] sm:$0xff] }
  0x47   :  { %401 = vmatmul.mubr.f32.gmra.mxu1 %v109_v41  ;;  %v80_v41 = vld [vmem:[%s1988_s1 + $0x128] sm:$0xff] }
  0x48   :  { %405 = vmatprep.mubr.f32.mxu1 %v112_v42  ;;  %v141_v42 = vld [vmem:[%s1988_s1 + $0x310] sm:$0xff] }
  0x49   :  { %246 = vmatmul.mubr.f32.gmra.mxu0 %v47_v43  ;;  %v144_v43 = vld [vmem:[%s1988_s1 + $0x328] sm:$0xff] }
  0x4a   :  { %250 = vmatprep.mubr.f32.mxu0 %v50_v44  ;;  %v79_v44 = vld [vmem:[%s1988_s1 + $0x120] sm:$0xff] }
  0x4b   :  { %406 = vmatmul.mubr.f32.gmra.mxu1 %v111_v45  ;;  %v82_v45 = vld [vmem:[%s1988_s1 + $0x138] sm:$0xff] }
  0x4c   :  { %410 = vmatprep.mubr.f32.mxu1 %v114_v46  ;;  %v143_v46 = vld [vmem:[%s1988_s1 + $0x320] sm:$0xff] }
  0x4d   :  { %251 = vmatmul.mubr.f32.gmra.mxu0 %v49_v47  ;;  %v146_v47 = vld [vmem:[%s1988_s1 + $0x338] sm:$0xff] }
  0x4e   :  { %255 = vmatprep.mubr.f32.mxu0 %v52_v48  ;;  %v81_v48 = vld [vmem:[%s1988_s1 + $0x130] sm:$0xff] }
  0x4f   :  { %411 = vmatmul.mubr.f32.gmra.mxu1 %v113_v49  ;;  %v84_v49 = vld [vmem:[%s1988_s1 + $0x148] sm:$0xff] }
  0x50   :  { %415 = vmatprep.mubr.f32.mxu1 %v116_v50  ;;  %v145_v50 = vld [vmem:[%s1988_s1 + $0x330] sm:$0xff] }
  0x51   :  { %256 = vmatmul.mubr.f32.gmra.mxu0 %v51_v51  ;;  %v148_v51 = vld [vmem:[%s1988_s1 + $0x348] sm:$0xff] }
  0x52   :  { %260 = vmatprep.mubr.f32.mxu0 %v54_v52  ;;  %v83_v52 = vld [vmem:[%s1988_s1 + $0x140] sm:$0xff] }
  0x53   :  { %416 = vmatmul.mubr.f32.gmra.mxu1 %v115_v53  ;;  %v86_v53 = vld [vmem:[%s1988_s1 + $0x158] sm:$0xff] }
  0x54   :  { %420 = vmatprep.mubr.f32.mxu1 %v118_v54  ;;  %v147_v54 = vld [vmem:[%s1988_s1 + $0x340] sm:$0xff] }
  0x55   :  { %261 = vmatmul.mubr.f32.gmra.mxu0 %v53_v55  ;;  %v150_v55 = vld [vmem:[%s1988_s1 + $0x358] sm:$0xff] }
  0x56   :  { %265 = vmatprep.mubr.f32.mxu0 %v56_v56  ;;  %v85_v56 = vld [vmem:[%s1988_s1 + $0x150] sm:$0xff] }
  0x57   :  { %421 = vmatmul.mubr.f32.gmra.mxu1 %v117_v57  ;;  %v88_v57 = vld [vmem:[%s1988_s1 + $0x168] sm:$0xff] }
  0x58   :  { %425 = vmatprep.mubr.f32.mxu1 %v120_v58  ;;  %v149_v58 = vld [vmem:[%s1988_s1 + $0x350] sm:$0xff] }
  0x59   :  { %266 = vmatmul.mubr.f32.gmra.mxu0 %v55_v59  ;;  %v152_v59 = vld [vmem:[%s1988_s1 + $0x368] sm:$0xff] }
  0x5a   :  { %270 = vmatprep.mubr.f32.mxu0 %v58_v60  ;;  %v87_v60 = vld [vmem:[%s1988_s1 + $0x160] sm:$0xff] }
  0x5b   :  { %426 = vmatmul.mubr.f32.gmra.mxu1 %v119_v61  ;;  %v90_v61 = vld [vmem:[%s1988_s1 + $0x178] sm:$0xff] }
  0x5c   :  { %430 = vmatprep.mubr.f32.mxu1 %v122_v62  ;;  %v151_v62 = vld [vmem:[%s1988_s1 + $0x360] sm:$0xff] }
  0x5d   :  { %271 = vmatmul.mubr.f32.gmra.mxu0 %v57_v63  ;;  %v154_v63 = vld [vmem:[%s1988_s1 + $0x378] sm:$0xff] }
  0x5e   :  { %275 = vmatprep.mubr.f32.mxu0 %v60_v0  ;;  %v89_v0 = vld [vmem:[%s1988_s1 + $0x170] sm:$0xff] }
  0x5f   :  { %431 = vmatmul.mubr.f32.gmra.mxu1 %v121_v1  ;;  %v92_v1 = vld [vmem:[%s1988_s1 + $0x188] sm:$0xff] }
  0x60   :  { %435 = vmatprep.mubr.f32.mxu1 %v124_v2  ;;  %v153_v2 = vld [vmem:[%s1988_s1 + $0x370] sm:$0xff] }
  0x61   :  { %276 = vmatmul.mubr.f32.gmra.mxu0 %v59_v3  ;;  %v156_v3 = vld [vmem:[%s1988_s1 + $0x388] sm:$0xff] }
  0x62   :  { %280 = vmatprep.mubr.f32.mxu0 %v62_v4  ;;  %v91_v4 = vld [vmem:[%s1988_s1 + $0x180] sm:$0xff] }
  0x63   :  { %436 = vmatmul.mubr.f32.gmra.mxu1 %v123_v5  ;;  %v94_v5 = vld [vmem:[%s1988_s1 + $0x198] sm:$0xff] }
  0x64   :  { %440 = vmatprep.mubr.f32.mxu1 %v126_v6  ;;  %v155_v6 = vld [vmem:[%s1988_s1 + $0x380] sm:$0xff] }
  0x65   :  { %281 = vmatmul.mubr.f32.gmra.mxu0 %v61_v7  ;;  %v158_v7 = vld [vmem:[%s1988_s1 + $0x398] sm:$0xff] }
  0x66   :  { %285 = vmatprep.mubr.f32.mxu0 %v64_v8  ;;  %v93_v8 = vld [vmem:[%s1988_s1 + $0x190] sm:$0xff] }
  0x67   :  { %441 = vmatmul.mubr.f32.gmra.mxu1 %v125_v9  ;;  %v96_v9 = vld [vmem:[%s1988_s1 + $0x1a8] sm:$0xff] }
  0x68   :  { %445 = vmatprep.mubr.f32.mxu1 %v128_v10  ;;  %v157_v10 = vld [vmem:[%s1988_s1 + $0x390] sm:$0xff] }
  0x69   :  { %286 = vmatmul.mubr.f32.gmra.mxu0 %v63_v11  ;;  %v160_v11 = vld [vmem:[%s1988_s1 + $0x3a8] sm:$0xff] }
  0x6a   :  { %290 = vmatprep.mubr.f32.mxu0 %v66_v12  ;;  %v95_v12 = vld [vmem:[%s1988_s1 + $0x1a0] sm:$0xff] }
  0x6b   :  { %446 = vmatmul.mubr.f32.gmra.mxu1 %v127_v13  ;;  %v98_v13 = vld [vmem:[%s1988_s1 + $0x1b8] sm:$0xff] }
  0x6c   :  { %450 = vmatprep.mubr.f32.mxu1 %v130_v14  ;;  %v159_v14 = vld [vmem:[%s1988_s1 + $0x3a0] sm:$0xff] }
  0x6d   :  { %291 = vmatmul.mubr.f32.gmra.mxu0 %v65_v15  ;;  %v162_v15 = vld [vmem:[%s1988_s1 + $0x3b8] sm:$0xff] }
  0x6e   :  { %295 = vmatprep.mubr.f32.mxu0 %v68_v16  ;;  %v97_v16 = vld [vmem:[%s1988_s1 + $0x1b0] sm:$0xff] }
  0x6f   :  { %451 = vmatmul.mubr.f32.gmra.mxu1 %v129_v17  ;;  %v100_v17 = vld [vmem:[%s1988_s1 + $0x1c8] sm:$0xff] }
  0x70   :  { %455 = vmatprep.mubr.f32.mxu1 %v132_v18  ;;  %v161_v18 = vld [vmem:[%s1988_s1 + $0x3b0] sm:$0xff] }
  0x71   :  { %296 = vmatmul.mubr.f32.gmra.mxu0 %v67_v19  ;;  %v164_v19 = vld [vmem:[%s1988_s1 + $0x3c8] sm:$0xff] }
  0x72   :  { %300 = vmatprep.mubr.f32.mxu0 %v70_v20  ;;  %v99_v20 = vld [vmem:[%s1988_s1 + $0x1c0] sm:$0xff] }
  0x73   :  { %456 = vmatmul.mubr.f32.gmra.mxu1 %v131_v21  ;;  %v102_v21 = vld [vmem:[%s1988_s1 + $0x1d8] sm:$0xff] }
  0x74   :  { %460 = vmatprep.mubr.f32.mxu1 %v134_v22  ;;  %v163_v22 = vld [vmem:[%s1988_s1 + $0x3c0] sm:$0xff] }
  0x75   :  { %301 = vmatmul.mubr.f32.gmra.mxu0 %v69_v23  ;;  %v166_v23 = vld [vmem:[%s1988_s1 + $0x3d8] sm:$0xff] }
  0x76   :  { %305 = vmatprep.mubr.f32.mxu0 %v72_v24  ;;  %v101_v24 = vld [vmem:[%s1988_s1 + $0x1d0] sm:$0xff] }
  0x77   :  { %461 = vmatmul.mubr.f32.gmra.mxu1 %v133_v25  ;;  %v104_v25 = vld [vmem:[%s1988_s1 + $0x1e8] sm:$0xff] }
  0x78   :  { %465 = vmatprep.mubr.f32.mxu1 %v136_v26  ;;  %v165_v26 = vld [vmem:[%s1988_s1 + $0x3d0] sm:$0xff] }
  0x79   :  { %306 = vmatmul.mubr.f32.gmra.mxu0 %v71_v27  ;;  %v168_v27 = vld [vmem:[%s1988_s1 + $0x3e8] sm:$0xff] }
  0x7a   :  { %310 = vmatprep.mubr.f32.mxu0 %v74_v28  ;;  %v103_v28 = vld [vmem:[%s1988_s1 + $0x1e0] sm:$0xff] }
  0x7b   :  { %466 = vmatmul.mubr.f32.gmra.mxu1 %v135_v29  ;;  %v106_v29 = vld [vmem:[%s1988_s1 + $0x1f8] sm:$0xff] }
  0x7c   :  { %470 = vmatprep.mubr.f32.mxu1 %v138_v30  ;;  %v167_v30 = vld [vmem:[%s1988_s1 + $0x3e0] sm:$0xff] }
  0x7d   :  { %311 = vmatmul.mubr.f32.gmra.mxu0 %v73_v31  ;;  %v170_v31 = vld [vmem:[%s1988_s1 + $0x3f8] sm:$0xff] }
  0x7e   :  { %315 = vmatprep.mubr.f32.mxu0 %v76_v32  ;;  %v105_v32 = vld [vmem:[%s1988_s1 + $0x1f0] sm:$0xff] }
  0x7f   :  { %471 = vmatmul.mubr.f32.gmra.mxu1 %v137_v34  ;;  %v169_v34 = vld [vmem:[%s1988_s1 + $0x3f0] sm:$0xff] }
  0x80   :  { %475 = vmatprep.mubr.f32.mxu1 %v140_v35 }
  0x81   :  { %316 = vmatmul.mubr.f32.gmra.mxu0 %v75_v36 }
  0x82   :  { %320 = vmatprep.mubr.f32.mxu0 %v78_v37 }
  0x83   :  { %476 = vmatmul.mubr.f32.gmra.mxu1 %v139_v38 }
  0x84   :  { %480 = vmatprep.mubr.f32.mxu1 %v142_v39 }
  0x85   :  { %321 = vmatmul.mubr.f32.gmra.mxu0 %v77_v40 }
  0x86   :  { %325 = vmatprep.mubr.f32.mxu0 %v80_v41 }
  0x87   :  { %481 = vmatmul.mubr.f32.gmra.mxu1 %v141_v42 }
  0x88   :  { %485 = vmatprep.mubr.f32.mxu1 %v144_v43 }
  0x89   :  { %326 = vmatmul.mubr.f32.gmra.mxu0 %v79_v44 }
  0x8a   :  { %330 = vmatprep.mubr.f32.mxu0 %v82_v45 }
  0x8b   :  { %486 = vmatmul.mubr.f32.gmra.mxu1 %v143_v46 }
  0x8c   :  { %490 = vmatprep.mubr.f32.mxu1 %v146_v47 }
  0x8d   :  { %331 = vmatmul.mubr.f32.gmra.mxu0 %v81_v48 }
  0x8e   :  { %335 = vmatprep.mubr.f32.mxu0 %v84_v49 }
  0x8f   :  { %491 = vmatmul.mubr.f32.gmra.mxu1 %v145_v50 }
  0x90   :  { %495 = vmatprep.mubr.f32.mxu1 %v148_v51 }
  0x91   :  { %336 = vmatmul.mubr.f32.gmra.mxu0 %v83_v52 }
  0x92   :  { %340 = vmatprep.mubr.f32.mxu0 %v86_v53 }
  0x93   :  { %496 = vmatmul.mubr.f32.gmra.mxu1 %v147_v54 }
  0x94   :  { %500 = vmatprep.mubr.f32.mxu1 %v150_v55 }
  0x95   :  { %341 = vmatmul.mubr.f32.gmra.mxu0 %v85_v56 }
  0x96   :  { %345 = vmatprep.mubr.f32.mxu0 %v88_v57 }
  0x97   :  { %501 = vmatmul.mubr.f32.gmra.mxu1 %v149_v58 }
  0x98   :  { %505 = vmatprep.mubr.f32.mxu1 %v152_v59 }
  0x99   :  { %346 = vmatmul.mubr.f32.gmra.mxu0 %v87_v60 }
  0x9a   :  { %350 = vmatprep.mubr.f32.mxu0 %v90_v61 }
  0x9b   :  { %506 = vmatmul.mubr.f32.gmra.mxu1 %v151_v62 }
  0x9c   :  { %510 = vmatprep.mubr.f32.mxu1 %v154_v63 }
  0x9d   :  { %351 = vmatmul.mubr.f32.gmra.mxu0 %v89_v0 }
  0x9e   :  { %355 = vmatprep.mubr.f32.mxu0 %v92_v1 }
  0x9f   :  { %511 = vmatmul.mubr.f32.gmra.mxu1 %v153_v2 }
  0xa0   :  { %515 = vmatprep.mubr.f32.mxu1 %v156_v3 }
  0xa1   :  { %356 = vmatmul.mubr.f32.gmra.mxu0 %v91_v4 }
  0xa2   :  { %360 = vmatprep.mubr.f32.mxu0 %v94_v5 }
  0xa3   :  { %516 = vmatmul.mubr.f32.gmra.mxu1 %v155_v6 }
  0xa4   :  { %520 = vmatprep.mubr.f32.mxu1 %v158_v7 }
  0xa5   :  { %361 = vmatmul.mubr.f32.gmra.mxu0 %v93_v8 }
  0xa6   :  { %365 = vmatprep.mubr.f32.mxu0 %v96_v9 }
  0xa7   :  { %521 = vmatmul.mubr.f32.gmra.mxu1 %v157_v10 }
  0xa8   :  { %525 = vmatprep.mubr.f32.mxu1 %v160_v11 }
  0xa9   :  { %366 = vmatmul.mubr.f32.gmra.mxu0 %v95_v12 }
  0xaa   :  { %370 = vmatprep.mubr.f32.mxu0 %v98_v13 }
  0xab   :  { %526 = vmatmul.mubr.f32.gmra.mxu1 %v159_v14 }
  0xac   :  { %530 = vmatprep.mubr.f32.mxu1 %v162_v15 }
  0xad   :  { %371 = vmatmul.mubr.f32.gmra.mxu0 %v97_v16 }
  0xae   :  { %375 = vmatprep.mubr.f32.mxu0 %v100_v17 }
  0xaf   :  { %531 = vmatmul.mubr.f32.gmra.mxu1 %v161_v18 }
  0xb0   :  { %535 = vmatprep.mubr.f32.mxu1 %v164_v19 }
  0xb1   :  { %376 = vmatmul.mubr.f32.gmra.mxu0 %v99_v20 }
  0xb2   :  { %380 = vmatprep.mubr.f32.mxu0 %v102_v21 }
  0xb3   :  { %536 = vmatmul.mubr.f32.gmra.mxu1 %v163_v22 }
  0xb4   :  { %540 = vmatprep.mubr.f32.mxu1 %v166_v23 }
  0xb5   :  { %381 = vmatmul.mubr.f32.gmra.mxu0 %v101_v24 }
  0xb6   :  { %385 = vmatprep.mubr.f32.mxu0 %v104_v25 }
  0xb7   :  { %541 = vmatmul.mubr.f32.gmra.mxu1 %v165_v26 }
  0xb8   :  { %545 = vmatprep.mubr.f32.mxu1 %v168_v27 }
  0xb9   :  { %386 = vmatmul.mubr.f32.gmra.mxu0 %v103_v28 }
  0xba   :  { %390 = vmatprep.mubr.f32.mxu0 %v106_v29 }
  0xbb   :  { %546 = vmatmul.mubr.f32.gmra.mxu1 %v167_v30 }
  0xbc   :  { %550 = vmatprep.mubr.f32.mxu1 %v170_v31 }
  0xbd   :  { %391 = vmatmul.mubr.f32.gmra.mxu0 %v105_v32 }
  0xbf   :  { %551 = vmatmul.mubr.f32.gmra.mxu1 %v169_v34 }
 0x101   :  { %v237_v35 = vpop.f32.mrf.mxu0 }
 0x102   :  { %v880_v26 = vmul.f32 -1.442695, %v237_v35 }
 0x103   :  { %v239_v36 = vpop.f32.mrf.mxu0  ;;  %v1716_v37 = vpop.f32.mrf.mxu1 }
 0x104   :  { %977 = vpow2.f32 %v880_v26 }
 0x105   :  { %v242_v38 = vpop.f32.mrf.mxu0  ;;  %v399_v39 = vpop.f32.mrf.mxu1 }
 0x106   :  { %v881_v29 = vmul.f32 -1.442695, %v242_v38 }
 0x107   :  { %v244_v40 = vpop.f32.mrf.mxu0  ;;  %v1718_v41 = vpop.f32.mrf.mxu1 }
 0x108   :  { %979 = vpow2.f32 %v881_v29 }
 0x109   :  { %v247_v42 = vpop.f32.mrf.mxu0  ;;  %v404_v43 = vpop.f32.mrf.mxu1 }
 0x10a   :  { %v882_v36 = vmul.f32 -1.442695, %v247_v42 }
 0x10b   :  { %v249_v44 = vpop.f32.mrf.mxu0  ;;  %v1720_v45 = vpop.f32.mrf.mxu1 }
 0x10c   :  { %981 = vpow2.f32 %v882_v36 }
 0x10d   :  { %v252_v46 = vpop.f32.mrf.mxu0  ;;  %v409_v47 = vpop.f32.mrf.mxu1 }
 0x10e   :  { %v883_v39 = vmul.f32 -1.442695, %v252_v46 }
 0x10f   :  { %v254_v48 = vpop.f32.mrf.mxu0  ;;  %v1722_v49 = vpop.f32.mrf.mxu1 }
 0x110   :  { %983 = vpow2.f32 %v883_v39 }
 0x111   :  { %v1724_v50 = vpop.f32.mrf.mxu0  ;;  %v414_v51 = vpop.f32.mrf.mxu1 }
 0x113   :  { %v259_v52 = vpop.f32.mrf.mxu0  ;;  %v1726_v53 = vpop.f32.mrf.mxu1 }
 0x115   :  { %v1728_v54 = vpop.f32.mrf.mxu0  ;;  %v419_v55 = vpop.f32.mrf.mxu1 }
 0x116   :  { %v884_v55 = vmul.f32 -1.442695, %v1724_v50 }
 0x117   :  { %v264_v56 = vpop.f32.mrf.mxu0  ;;  %v1730_v57 = vpop.f32.mrf.mxu1 }
 0x119   :  { %v1732_v58 = vpop.f32.mrf.mxu0  ;;  %v424_v59 = vpop.f32.mrf.mxu1 }
 0x11b   :  { %v269_v60 = vpop.f32.mrf.mxu0  ;;  %v1734_v61 = vpop.f32.mrf.mxu1 }
 0x11d   :  { %v1736_v62 = vpop.f32.mrf.mxu0  ;;  %v429_v63 = vpop.f32.mrf.mxu1 }
 0x11e   :  { %v978_v63 = vpop.eup %977 }
 0x11f   :  { %v274_v0 = vpop.f32.mrf.mxu0  ;;  %v1738_v1 = vpop.f32.mrf.mxu1 }
 0x120   :  { %v885_v0 = vmul.f32 -1.442695, %v1728_v54 }
 0x121   :  { %v1740_v2 = vpop.f32.mrf.mxu0  ;;  %v434_v3 = vpop.f32.mrf.mxu1 }
 0x123   :  { %v279_v4 = vpop.f32.mrf.mxu0  ;;  %v1742_v5 = vpop.f32.mrf.mxu1 }
 0x124   :  { %v980_v4 = vpop.eup %979 }
 0x125   :  { %v1744_v6 = vpop.f32.mrf.mxu0  ;;  %v439_v7 = vpop.f32.mrf.mxu1 }
 0x127   :  { %v284_v8 = vpop.f32.mrf.mxu0  ;;  %v1746_v9 = vpop.f32.mrf.mxu1 }
 0x129   :  { %v1748_v10 = vpop.f32.mrf.mxu0  ;;  %v444_v11 = vpop.f32.mrf.mxu1 }
 0x12a   :  { %v652_v11 = vadd.f32 1.0, %v978_v63 }
 0x12b   :  { %v289_v12 = vpop.f32.mrf.mxu0  ;;  %v1750_v13 = vpop.f32.mrf.mxu1 }
 0x12d   :  { %v1752_v14 = vpop.f32.mrf.mxu0  ;;  %v449_v15 = vpop.f32.mrf.mxu1 }
 0x12e   :  { %v653_v15 = vadd.f32 1.0, %v980_v4 }
 0x12f   :  { %v294_v16 = vpop.f32.mrf.mxu0  ;;  %v1754_v17 = vpop.f32.mrf.mxu1 }
 0x131   :  { %v1756_v18 = vpop.f32.mrf.mxu0  ;;  %v454_v19 = vpop.f32.mrf.mxu1 }
 0x132   :  { %v982_v19 = vpop.eup %981 }
 0x133   :  { %v299_v20 = vpop.f32.mrf.mxu0  ;;  %v1758_v21 = vpop.f32.mrf.mxu1 }
 0x134   :  { %v886_v20 = vmul.f32 -1.442695, %v1732_v58  ;;  %v984_v26 = vpop.eup %983 }
 0x135   :  { %v1760_v22 = vpop.f32.mrf.mxu0  ;;  %v459_v23 = vpop.f32.mrf.mxu1  ;;  %v655_v39 = vadd.f32 1.0, %v984_v26 }
 0x137   :  { %v304_v24 = vpop.f32.mrf.mxu0  ;;  %v1762_v25 = vpop.f32.mrf.mxu1 }
 0x139   :  { %v1764_v27 = vpop.f32.mrf.mxu0  ;;  %v464_v28 = vpop.f32.mrf.mxu1 }
 0x13b   :  { %v309_v30 = vpop.f32.mrf.mxu0  ;;  %v1766_v31 = vpop.f32.mrf.mxu1 }
 0x13c   :  { %v654_v30 = vadd.f32 1.0, %v982_v19 }
 0x13d   :  { %v1768_v32 = vpop.f32.mrf.mxu0  ;;  %v469_v34 = vpop.f32.mrf.mxu1 }
 0x13f   :  { %v314_v40 = vpop.f32.mrf.mxu0  ;;  %v1770_v43 = vpop.f32.mrf.mxu1 }
 0x141   :  { %v317_v44 = vpop.f32.mrf.mxu0  ;;  %v474_v47 = vpop.f32.mrf.mxu1 }
 0x142   :  { %v896_v35 = vmul.f32 -1.442695, %v317_v44 }
 0x143   :  { %v319_v48 = vpop.f32.mrf.mxu0  ;;  %v1772_v38 = vpop.f32.mrf.mxu1 }
 0x144   :  { %985 = vpow2.f32 %v896_v35  ;;  %v887_v48 = vmul.f32 -1.442695, %v1736_v62  ;;  %v889_v62 = vmul.f32 -1.442695, %v1744_v6 }
 0x145   :  { %v322_v51 = vpop.f32.mrf.mxu0  ;;  %v479_v52 = vpop.f32.mrf.mxu1 }
 0x146   :  { %v897_v56 = vmul.f32 -1.442695, %v322_v51 }
 0x147   :  { %v324_v59 = vpop.f32.mrf.mxu0  ;;  %v1775_v42 = vpop.f32.mrf.mxu1 }
 0x148   :  { %987 = vpow2.f32 %v897_v56  ;;  %v888_v56 = vmul.f32 -1.442695, %v1740_v2 }
 0x149   :  { %v327_v46 = vpop.f32.mrf.mxu0  ;;  %v484_v60 = vpop.f32.mrf.mxu1  ;;  %989 = vpow2.f32 %v884_v55 }
 0x14a   :  { %v898_v3 = vmul.f32 -1.442695, %v327_v46 }
 0x14b   :  { %v329_v7 = vpop.f32.mrf.mxu0  ;;  %v1778_v8 = vpop.f32.mrf.mxu1 }
 0x14c   :  { %991 = vpow2.f32 %v898_v3 }
 0x14d   :  { %v332_v12 = vpop.f32.mrf.mxu0  ;;  %v489_v50 = vpop.f32.mrf.mxu1  ;;  %993 = vpow2.f32 %v885_v0 }
 0x14e   :  { %v899_v16 = vmul.f32 -1.442695, %v332_v12 }
 0x14f   :  { %v334_v23 = vpop.f32.mrf.mxu0  ;;  %v1781_v24 = vpop.f32.mrf.mxu1 }
 0x150   :  { %995 = vpow2.f32 %v899_v16 }
 0x151   :  { %v986_v54 = vpop.eup %985  ;;  %997 = vrcp.f32 %v652_v11  ;;  %v337_v28 = vpop.f32.mrf.mxu0 }
 0x152   :  { %v494_v29 = vpop.f32.mrf.mxu1  ;;  %999 = vrcp.f32 %v653_v15  ;;  %v668_v34 = vadd.f32 1.0, %v986_v54  ;;  %v900_v36 = vmul.f32 -1.442695, %v337_v28  ;;  %v890_v28 = vmul.f32 -1.442695, %v1748_v10 }
 0x153   :  { %1001 = vpow2.f32 %v886_v20  ;;  %v339_v40 = vpop.f32.mrf.mxu0 }
 0x154   :  { %v1783_v44 = vpop.f32.mrf.mxu1  ;;  %1003 = vrcp.f32 %v668_v34 }
 0x155   :  { %v988_v58 = vpop.eup %987  ;;  %1005 = vpow2.f32 %v900_v36  ;;  %v342_v47 = vpop.f32.mrf.mxu0 }
 0x156   :  { %v499_v35 = vpop.f32.mrf.mxu1  ;;  %1007 = vrcp.f32 %v654_v30  ;;  %v669_v51 = vadd.f32 1.0, %v988_v58  ;;  %v901_v52 = vmul.f32 -1.442695, %v342_v47  ;;  %v990_v55 = vpop.eup %989 }
 0x157   :  { %1009 = vrcp.f32 %v655_v39  ;;  %v344_v59 = vpop.f32.mrf.mxu0  ;;  %v656_v3 = vadd.f32 1.0, %v990_v55 }
 0x158   :  { %v1787_v46 = vpop.f32.mrf.mxu1  ;;  %1011 = vrcp.f32 %v669_v51 }
 0x159   :  { %v992_v60 = vpop.eup %991  ;;  %1013 = vpow2.f32 %v901_v52  ;;  %v347_v63 = vpop.f32.mrf.mxu0 }
 0x15a   :  { %v504_v0 = vpop.f32.mrf.mxu1  ;;  %1015 = vpow2.f32 %v887_v48  ;;  %v670_v4 = vadd.f32 1.0, %v992_v60  ;;  %v902_v7 = vmul.f32 -1.442695, %v347_v63  ;;  %v994_v11 = vpop.eup %993 }
 0x15b   :  { %1017 = vpow2.f32 %v888_v56  ;;  %v349_v12 = vpop.f32.mrf.mxu0  ;;  %v657_v20 = vadd.f32 1.0, %v994_v11 }
 0x15c   :  { %v1790_v50 = vpop.f32.mrf.mxu1  ;;  %1019 = vrcp.f32 %v670_v4 }
 0x15d   :  { %v996_v2 = vpop.eup %995  ;;  %1021 = vpow2.f32 %v902_v7  ;;  %v352_v15 = vpop.f32.mrf.mxu0  ;;  %v891_v7 = vmul.f32 -1.442695, %v1752_v14 }
 0x15e   :  { %v509_v16 = vpop.f32.mrf.mxu1  ;;  %v1792_v19 = vpop.eup %997  ;;  %1023 = vrcp.f32 %v656_v3  ;;  %v671_v23 = vadd.f32 1.0, %v996_v2  ;;  %v903_v26 = vmul.f32 -1.442695, %v352_v15 }
 0x15f   :  { %v1794_v54 = vpop.eup %999  ;;  %1025 = vpow2.f32 %v889_v62  ;;  %v354_v6 = vpop.f32.mrf.mxu0 }
 0x160   :  { %v1797_v29 = vpop.f32.mrf.mxu1  ;;  %v1002_v30 = vpop.eup %1001  ;;  %1027 = vrcp.f32 %v671_v23 }
 0x161   :  { %v1004_v34 = vpop.eup %1003  ;;  %1029 = vpow2.f32 %v903_v26  ;;  %v357_v36 = vpop.f32.mrf.mxu0  ;;  %v658_v48 = vadd.f32 1.0, %v1002_v30 }
 0x162   :  { %v514_v39 = vpop.f32.mrf.mxu1  ;;  %v1006_v40 = vpop.eup %1005  ;;  %1031 = vrcp.f32 %v657_v20  ;;  %v748_v58 = vmul.f32 %v1004_v34, %v1772_v38  ;;  %v904_v47 = vmul.f32 -1.442695, %v357_v36 }
 0x163   :  { %v1800_v35 = vpop.eup %1007  ;;  %1033 = vpow2.f32 %v890_v28  ;;  %v672_v51 = vadd.f32 1.0, %v1006_v40  ;;  %v359_v10 = vpop.f32.mrf.mxu0 }
 0x164   :  { %v1802_v52 = vpop.f32.mrf.mxu1  ;;  %v1804_v55 = vpop.eup %1009  ;;  %v764_v56 = vadd.f32 %v748_v58, %v1716_v37  ;;  %1035 = vpow2.f32 %v904_v47 }
 0x165   :  { %v1012_v59 = vpop.eup %1011  ;;  %1037 = vrcp.f32 %v672_v51  ;;  %v362_v60 = vpop.f32.mrf.mxu0 }
 0x166   :  { %v519_v63 = vpop.f32.mrf.mxu1  ;;  %v1014_v0 = vpop.eup %1013  ;;  %1039 = vtanh.f32 %v764_v56  ;;  %v749_v38 = vmul.f32 %v1012_v59, %v1775_v42  ;;  %v905_v3 = vmul.f32 -1.442695, %v362_v60 }
 0x167   :  { %v1016_v4 = vpop.eup %1015  ;;  %1041 = vrcp.f32 %v658_v48  ;;  %v673_v11 = vadd.f32 1.0, %v1014_v0  ;;  %v364_v62 = vpop.f32.mrf.mxu0 }
 0x168   :  { %v1809_v12 = vpop.f32.mrf.mxu1  ;;  %v1018_v2 = vpop.eup %1017  ;;  %v765_v37 = vadd.f32 %v749_v38, %v1718_v41  ;;  %1043 = vpow2.f32 %v905_v3  ;;  %v659_v14 = vadd.f32 1.0, %v1016_v4  ;;  %v812_v38 = vsub.f32 1.0, %v1792_v19 }
 0x169   :  { %v1020_v15 = vpop.eup %1019  ;;  %1045 = vrcp.f32 %v673_v11  ;;  %v367_v16 = vpop.f32.mrf.mxu0  ;;  %v660_v10 = vadd.f32 1.0, %v1018_v2 }
 0x16a   :  { %v524_v20 = vpop.f32.mrf.mxu1  ;;  %v1022_v23 = vpop.eup %1021  ;;  %1047 = vtanh.f32 %v765_v37  ;;  %v750_v42 = vmul.f32 %v1020_v15, %v1778_v8  ;;  %v906_v26 = vmul.f32 -1.442695, %v367_v16 }
 0x16b   :  { %v1813_v28 = vpop.eup %1023  ;;  %1049 = vpow2.f32 %v891_v7  ;;  %v674_v6 = vadd.f32 1.0, %v1022_v23  ;;  %v369_v30 = vpop.f32.mrf.mxu0  ;;  %v892_v7 = vmul.f32 -1.442695, %v1756_v18  ;;  %v796_v20 = vmul.f32 %v1792_v19, %v1328_v33 }
 0x16c   :  { %v1815_v34 = vpop.f32.mrf.mxu1  ;;  %v1817_v36 = vpop.eup %1025  ;;  %v766_v41 = vadd.f32 %v750_v42, %v1720_v45  ;;  %1051 = vpow2.f32 %v906_v26  ;;  %v813_v18 = vsub.f32 1.0, %v1794_v54 }
 0x16d   :  { %v1028_v39 = vpop.eup %1027  ;;  %1053 = vrcp.f32 %v674_v6  ;;  %v372_v40 = vpop.f32.mrf.mxu0 }
 0x16e   :  { %v529_v58 = vpop.f32.mrf.mxu1  ;;  %v1030_v47 = vpop.eup %1029  ;;  %1055 = vtanh.f32 %v766_v41  ;;  %v751_v8 = vmul.f32 %v1028_v39, %v1781_v24  ;;  %v907_v48 = vmul.f32 -1.442695, %v372_v40 }
 0x16f   :  { %v1821_v51 = vpop.eup %1031  ;;  %1057 = vrcp.f32 %v659_v14  ;;  %v675_v56 = vadd.f32 1.0, %v1030_v47  ;;  %v374_v59 = vpop.f32.mrf.mxu0 }
 0x170   :  { %v1823_v60 = vpop.f32.mrf.mxu1  ;;  %v1825_v63 = vpop.eup %1033  ;;  %v767_v45 = vadd.f32 %v751_v8, %v1722_v49  ;;  %1059 = vpow2.f32 %v907_v48 }
 0x171   :  { %v1036_v0 = vpop.eup %1035  ;;  %1061 = vrcp.f32 %v675_v56  ;;  %v377_v3 = vpop.f32.mrf.mxu0 }
 0x172   :  { %v534_v24 = vpop.f32.mrf.mxu1  ;;  %v1038_v4 = vpop.eup %1037  ;;  %v676_v11 = vadd.f32 1.0, %v1036_v0  ;;  %1063 = vtanh.f32 %v767_v45  ;;  %v908_v62 = vmul.f32 -1.442695, %v377_v3 }
 0x173   :  { %v1040_v2 = vpop.eup %1039  ;;  %1065 = vrcp.f32 %v660_v10  ;;  %v752_v37 = vmul.f32 %v1038_v4, %v1783_v44  ;;  %v379_v15 = vpop.f32.mrf.mxu0 }
 0x174   :  { %v1831_v16 = vpop.f32.mrf.mxu1  ;;  %v1833_v49 = vpop.eup %1041  ;;  %v828_v23 = vmul.f32 %v1040_v2, %v812_v38  ;;  %1067 = vrcp.f32 %v676_v11  ;;  %v661_v38 = vadd.f32 1.0, %v1817_v36 }
 0x175   :  { %v1044_v42 = vpop.eup %1043  ;;  %v768_v26 = vadd.f32 %v752_v37, %v1726_v53  ;;  %1069 = vpow2.f32 %v908_v62  ;;  %v382_v14 = vpop.f32.mrf.mxu0  ;;  %v1137_v53 = vld [vmem:[%s1987_s0 + $0x88] sm:$0xff] }
 0x176   :  { %v539_v6 = vpop.f32.mrf.mxu1  ;;  %v1046_v30 = vpop.eup %1045  ;;  %1071 = vpow2.f32 %v892_v7  ;;  %v844_v44 = vadd.f32 %v828_v23, %v796_v20  ;;  %v677_v41 = vadd.f32 1.0, %v1044_v42  ;;  %v909_v39 = vmul.f32 -1.442695, %v382_v14 }
 0x177   :  { %v1048_v40 = vpop.eup %1047  ;;  %1073 = vtanh.f32 %v768_v26  ;;  %v753_v58 = vmul.f32 %v1046_v30, %v1787_v46  ;;  %v384_v33 = vpop.f32.mrf.mxu0  ;;  %v797_v8 = vmul.f32 %v1137_v53, %v1794_v54  ;;  %v814_v46 = vsub.f32 1.0, %v1800_v35 }
 0x178   :  { %v1840_v19 = vpop.f32.mrf.mxu1  ;;  %v1842_v47 = vpop.eup %1049  ;;  %860 = vst [vmem:[%s1989_s2] sm:$0xff] %v844_v44  ;;  %v829_v48 = vmul.f32 %v1048_v40, %v813_v18  ;;  %1075 = vrcp.f32 %v677_v41  ;;  %v815_v20 = vsub.f32 1.0, %v1804_v55 }
 0x179   :  { %v1052_v10 = vpop.eup %1051  ;;  %v769_v56 = vadd.f32 %v753_v58, %v1730_v57  ;;  %1077 = vpow2.f32 %v909_v39  ;;  %v387_v59 = vpop.f32.mrf.mxu0  ;;  %v1138_v57 = vld [vmem:[%s1987_s0 + $0x90] sm:$0xff]  ;;  %v894_v58 = vmul.f32 -1.442695, %v1764_v27  ;;  %v816_v27 = vsub.f32 1.0, %v1813_v28 }
 0x17a   :  { %v544_v45 = vpop.f32.mrf.mxu1  ;;  %v1054_v0 = vpop.eup %1053  ;;  %v845_v3 = vadd.f32 %v829_v48, %v797_v8  ;;  %v678_v24 = vadd.f32 1.0, %v1052_v10  ;;  %v910_v54 = vmul.f32 -1.442695, %v387_v59  ;;  %v798_v37 = vmul.f32 %v1138_v57, %v1800_v35 }
 0x17b   :  { %v1056_v4 = vpop.eup %1055  ;;  %1079 = vtanh.f32 %v769_v56  ;;  %v754_v7 = vmul.f32 %v1054_v0, %v1790_v50  ;;  %v389_v11 = vpop.f32.mrf.mxu0  ;;  %v893_v50 = vmul.f32 -1.442695, %v1760_v22  ;;  %v895_v0 = vmul.f32 -1.442695, %v1768_v32 }
 0x17c   :  { %v1855_v62 = vpop.f32.mrf.mxu1  ;;  %v1857_v2 = vpop.eup %1057  ;;  %861 = vst [vmem:[%s1989_s2 + $0x8] sm:$0xff] %v845_v3  ;;  %v830_v36 = vmul.f32 %v1056_v4, %v814_v46  ;;  %1081 = vrcp.f32 %v678_v24  ;;  %v817_v4 = vsub.f32 1.0, %v1821_v51 }
 0x17d   :  { %v1060_v15 = vpop.eup %1059  ;;  %v770_v23 = vadd.f32 %v754_v7, %v1734_v61  ;;  %1083 = vpow2.f32 %v910_v54  ;;  %v392_v42 = vpop.f32.mrf.mxu0  ;;  %v1139_v61 = vld [vmem:[%s1987_s0 + $0x98] sm:$0xff] }
 0x17e   :  { %v549_v18 = vpop.f32.mrf.mxu1  ;;  %v1062_v26 = vpop.eup %1061  ;;  %1085 = vrcp.f32 %v661_v38  ;;  %v846_v14 = vadd.f32 %v830_v36, %v798_v37  ;;  %v679_v35 = vadd.f32 1.0, %v1060_v15  ;;  %v911_v6 = vmul.f32 -1.442695, %v392_v42 }
 0x17f   :  { %v1064_v30 = vpop.eup %1063  ;;  %1087 = vtanh.f32 %v770_v23  ;;  %v755_v44 = vmul.f32 %v1062_v26, %v1797_v29  ;;  %v394_v41 = vpop.f32.mrf.mxu0  ;;  %v799_v40 = vmul.f32 %v1139_v61, %v1804_v55  ;;  %v662_v55 = vadd.f32 1.0, %v1825_v63  ;;  %v1142_v26 = vld [vmem:[%s1987_s0 + $0xb0] sm:$0xff] }
 0x180   :  { %v1870_v39 = vpop.f32.mrf.mxu1  ;;  %v1872_v22 = vpop.eup %1065  ;;  %862 = vst [vmem:[%s1989_s2 + $0x10] sm:$0xff] %v846_v14  ;;  %v831_v33 = vmul.f32 %v1064_v30, %v815_v20  ;;  %1089 = vrcp.f32 %v679_v35  ;;  %v802_v14 = vmul.f32 %v1142_v26, %v1833_v49  ;;  %v819_v41 = vsub.f32 1.0, %v1857_v2 }
 0x181   :  { %v1068_v29 = vpop.eup %1067  ;;  %v771_v53 = vadd.f32 %v755_v44, %v1738_v1  ;;  %1091 = vpow2.f32 %v911_v6 }
 0x182   :  { %v554_v8 = vpop.f32.mrf.mxu1  ;;  %v1070_v48 = vpop.eup %1069  ;;  %1093 = vpow2.f32 %v893_v50  ;;  %v847_v10 = vadd.f32 %v831_v33, %v799_v40  ;;  %v756_v46 = vmul.f32 %v1068_v29, %v1802_v52  ;;  %v1140_v52 = vld [vmem:[%s1987_s0 + $0xa0] sm:$0xff]  ;;  %v1143_v33 = vld [vmem:[%s1987_s0 + $0xb8] sm:$0xff] }
 0x183   :  { %v1072_v56 = vpop.eup %1071  ;;  %v680_v59 = vadd.f32 1.0, %v1070_v48  ;;  %1095 = vtanh.f32 %v771_v53  ;;  %v800_v63 = vmul.f32 %v1140_v52, %v1813_v28  ;;  %v1141_v28 = vld [vmem:[%s1987_s0 + $0xa8] sm:$0xff]  ;;  %v803_v29 = vmul.f32 %v1143_v33, %v1857_v2  ;;  %v1144_v2 = vld [vmem:[%s1987_s0 + $0xc0] sm:$0xff]  ;;  %v1150_v33 = vld [vmem:[%s1987_s0 + $0xf0] sm:$0xff] }
 0x184   :  { %v1074_v45 = vpop.eup %1073  ;;  %1097 = vpow2.f32 %v894_v58  ;;  %863 = vst [vmem:[%s1989_s2 + $0x18] sm:$0xff] %v847_v10  ;;  %v772_v1 = vadd.f32 %v756_v46, %v1742_v5  ;;  %v663_v5 = vadd.f32 1.0, %v1842_v47  ;;  %v801_v36 = vmul.f32 %v1141_v28, %v1821_v51 }
 0x185   :  { %v1076_v38 = vpop.eup %1075  ;;  %v832_v3 = vmul.f32 %v1074_v45, %v816_v27  ;;  %1099 = vrcp.f32 %v680_v59  ;;  %v664_v44 = vadd.f32 1.0, %v1072_v56  ;;  %v820_v48 = vsub.f32 1.0, %v1872_v22 }
 0x186   :  { %v1078_v24 = vpop.eup %1077  ;;  %1101 = vtanh.f32 %v772_v1  ;;  %v757_v54 = vmul.f32 %v1076_v38, %v1809_v12 }
 0x187   :  { %1103 = vrcp.f32 %v662_v55  ;;  %v848_v32 = vadd.f32 %v832_v3, %v800_v63  ;;  %v681_v7 = vadd.f32 1.0, %v1078_v24  ;;  %v804_v55 = vmul.f32 %v1144_v2, %v1872_v22  ;;  %v1145_v22 = vld [vmem:[%s1987_s0 + $0xc8] sm:$0xff] }
 0x188   :  { %v1080_v11 = vpop.eup %1079  ;;  %1105 = vpow2.f32 %v895_v0  ;;  %v773_v57 = vadd.f32 %v757_v54, %v1746_v9  ;;  %v818_v9 = vsub.f32 1.0, %v1833_v49 }
 0x189   :  { %v1082_v37 = vpop.eup %1081  ;;  %864 = vst [vmem:[%s1989_s2 + $0x20] sm:$0xff] %v848_v32  ;;  %v833_v12 = vmul.f32 %v1080_v11, %v817_v4  ;;  %1107 = vrcp.f32 %v681_v7 }
 0x18a   :  { %v1084_v15 = vpop.eup %1083  ;;  %1109 = vtanh.f32 %v773_v57  ;;  %v758_v47 = vmul.f32 %v1082_v37, %v1815_v34  ;;  %v1146_v57 = vld [vmem:[%s1987_s0 + $0xd0] sm:$0xff] }
 0x18b   :  { %v1086_v50 = vpop.eup %1085  ;;  %v849_v20 = vadd.f32 %v833_v12, %v801_v36  ;;  %v682_v23 = vadd.f32 1.0, %v1084_v15  ;;  %1111 = vrcp.f32 %v663_v5 }
 0x18c   :  { %v1088_v42 = vpop.eup %1087  ;;  %v774_v18 = vadd.f32 %v758_v47, %v1750_v13  ;;  %v805_v3 = vmul.f32 %v1145_v22, %v1086_v50 }
 0x18d   :  { %v1090_v51 = vpop.eup %1089  ;;  %865 = vst [vmem:[%s1989_s2 + $0x28] sm:$0xff] %v849_v20  ;;  %v834_v34 = vmul.f32 %v1088_v42, %v818_v9  ;;  %1113 = vrcp.f32 %v682_v23  ;;  %v1147_v20 = vld [vmem:[%s1987_s0 + $0xd8] sm:$0xff] }
 0x18e   :  { %v1092_v35 = vpop.eup %1091  ;;  %1115 = vtanh.f32 %v774_v18  ;;  %v759_v6 = vmul.f32 %v1090_v51, %v1823_v60 }
 0x18f   :  { %v1094_v30 = vpop.eup %1093  ;;  %v850_v13 = vadd.f32 %v834_v34, %v802_v14  ;;  %v683_v61 = vadd.f32 1.0, %v1092_v35 }
 0x190   :  { %v1096_v40 = vpop.eup %1095  ;;  %v775_v58 = vadd.f32 %v759_v6, %v1754_v17  ;;  %v665_v8 = vadd.f32 1.0, %v1094_v30 }
 0x191   :  { %v1098_v49 = vpop.eup %1097  ;;  %866 = vst [vmem:[%s1989_s2 + $0x30] sm:$0xff] %v850_v13  ;;  %v835_v60 = vmul.f32 %v1096_v40, %v819_v41  ;;  %1117 = vrcp.f32 %v683_v61 }
 0x192   :  { %v1100_v53 = vpop.eup %1099  ;;  %1119 = vtanh.f32 %v775_v58  ;;  %v666_v1 = vadd.f32 1.0, %v1098_v49 }
 0x193   :  { %v1102_v10 = vpop.eup %1101  ;;  %1121 = vrcp.f32 %v664_v44  ;;  %v851_v17 = vadd.f32 %v835_v60, %v803_v29  ;;  %v760_v46 = vmul.f32 %v1100_v53, %v1831_v16  ;;  %v821_v16 = vsub.f32 1.0, %v1086_v50 }
 0x194   :  { %v1104_v56 = vpop.eup %1103  ;;  %v836_v27 = vmul.f32 %v1102_v10, %v820_v48  ;;  %1123 = vrcp.f32 %v665_v8  ;;  %v1151_v10 = vld [vmem:[%s1987_s0 + $0xf8] sm:$0xff] }
 0x195   :  { %v1106_v59 = vpop.eup %1105  ;;  %867 = vst [vmem:[%s1989_s2 + $0x38] sm:$0xff] %v851_v17  ;;  %v776_v45 = vadd.f32 %v760_v46, %v1758_v21  ;;  %v822_v11 = vsub.f32 1.0, %v1104_v56  ;;  %v806_v37 = vmul.f32 %v1146_v57, %v1104_v56 }
 0x196   :  { %v1108_v0 = vpop.eup %1107  ;;  %v852_v38 = vadd.f32 %v836_v27, %v804_v55  ;;  %v667_v4 = vadd.f32 1.0, %v1106_v59 }
 0x197   :  { %v1110_v52 = vpop.eup %1109  ;;  %1125 = vtanh.f32 %v776_v45  ;;  %v761_v63 = vmul.f32 %v1108_v0, %v1840_v19 }
 0x198   :  { %868 = vst [vmem:[%s1989_s2 + $0x40] sm:$0xff] %v852_v38  ;;  %v837_v24 = vmul.f32 %v1110_v52, %v821_v16  ;;  %v1112_v21 = vpop.eup %1111  ;;  %1127 = vrcp.f32 %v666_v1 }
 0x199   :  { %v777_v54 = vadd.f32 %v761_v63, %v1762_v25  ;;  %v823_v15 = vsub.f32 1.0, %v1112_v21  ;;  %v807_v9 = vmul.f32 %v1147_v20, %v1112_v21 }
 0x19a   :  { %v1114_v32 = vpop.eup %1113  ;;  %v853_v7 = vadd.f32 %v837_v24, %v805_v3 }
 0x19b   :  { %v1116_v5 = vpop.eup %1115  ;;  %1129 = vtanh.f32 %v777_v54  ;;  %v762_v19 = vmul.f32 %v1114_v32, %v1855_v62 }
 0x19c   :  { %869 = vst [vmem:[%s1989_s2 + $0x48] sm:$0xff] %v853_v7  ;;  %v838_v28 = vmul.f32 %v1116_v5, %v822_v11  ;;  %1131 = vrcp.f32 %v667_v4 }
 0x19d   :  { %v778_v25 = vadd.f32 %v762_v19, %v1766_v31 }
 0x19e   :  { %v1118_v36 = vpop.eup %1117  ;;  %v854_v12 = vadd.f32 %v838_v28, %v806_v37 }
 0x19f   :  { %v1120_v47 = vpop.eup %1119  ;;  %1133 = vtanh.f32 %v778_v25  ;;  %v763_v62 = vmul.f32 %v1118_v36, %v1870_v39  ;;  %v1148_v39 = vld [vmem:[%s1987_s0 + $0xe0] sm:$0xff] }
 0x1a0   :  { %v1122_v50 = vpop.eup %1121  ;;  %870 = vst [vmem:[%s1989_s2 + $0x50] sm:$0xff] %v854_v12  ;;  %v839_v23 = vmul.f32 %v1120_v47, %v823_v15 }
 0x1a1   :  { %v779_v31 = vadd.f32 %v763_v62, %v1770_v43  ;;  %v1124_v18 = vpop.eup %1123  ;;  %v824_v51 = vsub.f32 1.0, %v1122_v50  ;;  %v808_v14 = vmul.f32 %v1148_v39, %v1122_v50  ;;  %v1149_v43 = vld [vmem:[%s1987_s0 + $0xe8] sm:$0xff] }
 0x1a2   :  { %v855_v42 = vadd.f32 %v839_v23, %v807_v9  ;;  %v825_v30 = vsub.f32 1.0, %v1124_v18  ;;  %v809_v13 = vmul.f32 %v1149_v43, %v1124_v18 }
 0x1a3   :  { %1135 = vtanh.f32 %v779_v31 }
 0x1a4   :  { %v1126_v26 = vpop.eup %1125  ;;  %871 = vst [vmem:[%s1989_s2 + $0x58] sm:$0xff] %v855_v42 }
 0x1a5   :  { %v840_v34 = vmul.f32 %v1126_v26, %v824_v51  ;;  %v1128_v35 = vpop.eup %1127 }
 0x1a6   :  { %v826_v58 = vsub.f32 1.0, %v1128_v35  ;;  %v810_v29 = vmul.f32 %v1150_v33, %v1128_v35 }
 0x1a7   :  { %v856_v6 = vadd.f32 %v840_v34, %v808_v14 }
 0x1a8   :  { %v1130_v44 = vpop.eup %1129 }
 0x1a9   :  { %872 = vst [vmem:[%s1989_s2 + $0x60] sm:$0xff] %v856_v6  ;;  %v841_v41 = vmul.f32 %v1130_v44, %v825_v30  ;;  %v1132_v61 = vpop.eup %1131 }
 0x1aa   :  { %v827_v8 = vsub.f32 1.0, %v1132_v61  ;;  %v811_v17 = vmul.f32 %v1151_v10, %v1132_v61 }
 0x1ab   :  { %v857_v40 = vadd.f32 %v841_v41, %v809_v13 }
 0x1ac   :  { %v1134_v49 = vpop.eup %1133 }
 0x1ad   :  { %873 = vst [vmem:[%s1989_s2 + $0x68] sm:$0xff] %v857_v40  ;;  %v842_v60 = vmul.f32 %v1134_v49, %v826_v58 }
 0x1af   :  { %v858_v53 = vadd.f32 %v842_v60, %v810_v29 }
 0x1b0   :  { %v1136_v48 = vpop.eup %1135 }
 0x1b1   :  { %874 = vst [vmem:[%s1989_s2 + $0x70] sm:$0xff] %v858_v53  ;;  %v843_v46 = vmul.f32 %v1136_v48, %v827_v8 }
 0x1b3   :  { %v859_v56 = vadd.f32 %v843_v46, %v811_v17 }
 0x1b5   :  { %875 = vst [vmem:[%s1989_s2 + $0x78] sm:$0xff] %v859_v56 }

</bundles_post_ra>
